<compile_context>
chip_gen: v7x
topology: tpu7x:2x2x1
jax: 0.10.0
libtpu: 0.0.40
codegen_flags: <defaults>
</compile_context>

<pallas_src>
import functools

import jax
import jax.numpy as jnp
from jax.experimental import pallas as pl
from jax.experimental.pallas import tpu as pltpu

IN_DIM = 512      # fixed by the module: nn.Linear(512, hidden_dim)
_LANE = 128       # vreg lane width
_SUBLANE = 8      # vreg sublane count (f32)


def _round_up(n, m):
    return ((n + m - 1) // m) * m


def _mlp_kernel(x_ref, w1_ref, b1_ref, w2_ref, b2_ref, o_ref):
    # x: (bb, 512), w1: (512, H_pad), b1: (1, H_pad),
    # w2: (H_pad, C_pad), b2: (1, C_pad), o: (bb, C_pad)
    x = x_ref[...]
    # Linear 1 (MXU matmul, f32 accumulate) + bias, then ReLU (VPU)
    h = jnp.dot(x, w1_ref[...], preferred_element_type=jnp.float32) + b1_ref[...]
    h = jnp.maximum(h, 0.0)
    # Linear 2 + bias
    y = jnp.dot(h, w2_ref[...], preferred_element_type=jnp.float32) + b2_ref[...]
    o_ref[...] = y.astype(o_ref.dtype)


@functools.partial(jax.jit, static_argnames=("block_b",))
def blip2clip_mlp_forward(x, w1, b1, w2, b2, *, block_b=512):
    """Pallas forward of BLIP2CLIP_TextImage_MLP.

    x:  (B, 512) float32
    w1: (512, H), b1: (H,)   -- l1 weight (transposed) and bias
    w2: (H, C),   b2: (C,)   -- l2 weight (transposed) and bias
    returns (B, C) float32
    """
    B = x.shape[0]
    H = w1.shape[1]
    C = w2.shape[1]

    # Lane-pad hidden and output feature dims to multiples of 128.  Padded
    # hidden units have zero weight + zero bias -> relu(0) = 0, and their w2
    # rows are zero, so the padded math is exactly equivalent.
    H_pad = _round_up(max(H, _LANE), _LANE)
    C_pad = _round_up(max(C, _LANE), _LANE)

    w1_p = jnp.zeros((IN_DIM, H_pad), x.dtype).at[:, :H].set(w1)
    b1_p = jnp.zeros((1, H_pad), x.dtype).at[0, :H].set(b1)
    w2_p = jnp.zeros((H_pad, C_pad), x.dtype).at[:H, :C].set(w2)
    b2_p = jnp.zeros((1, C_pad), x.dtype).at[0, :C].set(b2)

    # Large batch tile; clamp for tiny B (sublane-aligned) and zero-pad the
    # batch so the grid divides evenly.  Padded rows are sliced off below.
    bb = min(block_b, _round_up(B, _SUBLANE))
    B_pad = _round_up(B, bb)
    x_p = x if B_pad == B else jnp.zeros((B_pad, IN_DIM), x.dtype).at[:B].set(x)

    grid = (B_pad // bb,)

    # VMEM footprint per step (f32, bb=512, H_pad=C_pad=128):
    #   x tile 1 MiB (x2 buffers) + out tile 256 KiB (x2) + weights ~320 KiB
    # -> well under the 32 MiB scoped default on every generation.
    out = pl.pallas_call(
        _mlp_kernel,
        out_shape=jax.ShapeDtypeStruct((B_pad, C_pad), x.dtype),
        grid_spec=pl.GridSpec(
            grid=grid,
            in_specs=[
                pl.BlockSpec((bb, IN_DIM), lambda i: (i, 0)),      # x tile
                pl.BlockSpec((IN_DIM, H_pad), lambda i: (0, 0)),   # w1 (resident)
                pl.BlockSpec((1, H_pad), lambda i: (0, 0)),        # b1
                pl.BlockSpec((H_pad, C_pad), lambda i: (0, 0)),    # w2 (resident)
                pl.BlockSpec((1, C_pad), lambda i: (0, 0)),        # b2
            ],
            out_specs=pl.BlockSpec((bb, C_pad), lambda i: (i, 0)),
        ),
        compiler_params=pltpu.CompilerParams(
            dimension_semantics=("parallel",)),
    )(x_p, w1_p, b1_p, w2_p, b2_p)

    # Slice off batch-pad rows and lane-pad columns.
    return out[:B, :C]


def reference_forward(x, w1, b1, w2, b2):
    h = jnp.maximum(x @ w1 + b1, 0.0)
    return h @ w2 + b2


if __name__ == "__main__":
    # Small, module-consistent shapes: hidden_dim=32, num_classes=16.
    H, C = 32, 16

    key = jax.random.PRNGKey(0)
    k_x, k_w1, k_b1, k_w2, k_b2 = jax.random.split(key, 5)

    # Deterministic synthetic parameters (PyTorch Linear-like uniform init).
    lim1 = 1.0 / jnp.sqrt(IN_DIM)
    w1 = jax.random.uniform(k_w1, (IN_DIM, H), jnp.float32, -lim1, lim1)
    b1 = jax.random.uniform(k_b1, (H,), jnp.float32, -lim1, lim1)
    lim2 = 1.0 / jnp.sqrt(H)
    w2 = jax.random.uniform(k_w2, (H, C), jnp.float32, -lim2, lim2)
    b2 = jax.random.uniform(k_b2, (C,), jnp.float32, -lim2, lim2)

    # Test both a tile-aligned batch and a non-divisible batch (tail handling).
    for B in (8, 10):
        x = jax.random.normal(jax.random.fold_in(k_x, B), (B, IN_DIM),
                              dtype=jnp.float32)
        out = jax.block_until_ready(blip2clip_mlp_forward(x, w1, b1, w2, b2))
        ref = reference_forward(x, w1, b1, w2, b2)
        assert out.shape == (B, C)
        assert jnp.allclose(out, ref, atol=1e-4, rtol=1e-4), \
            f"mismatch vs reference at B={B}"

    print("KERNEL_OK")
</pallas_src>

<mosaic_0001>
module attributes {stable_mosaic.version = 11 : i64} {
  func.func @_mlp_kernel(%arg0: i32, %arg1: memref<8x512xf32, #tpu.memory_space<vmem>>, %arg2: memref<512x128xf32, #tpu.memory_space<vmem>>, %arg3: memref<1x128xf32, #tpu.memory_space<vmem>>, %arg4: memref<128x128xf32, #tpu.memory_space<vmem>>, %arg5: memref<1x128xf32, #tpu.memory_space<vmem>>, %arg6: memref<8x128xf32, #tpu.memory_space<vmem>>) attributes {dimension_semantics = [#tpu.dimension_semantics<parallel>], iteration_bounds = array<i64: 1>, scalar_prefetch = 0 : i64, scratch_operands = 0 : i64, tpu.core_type = #tpu.core_type<tc>, window_params = [{transform_indices = @transform_0, window_bounds = array<i64: 8, 512>}, {pipeline_mode = #tpu.pipeline_mode<synchronous>, transform_indices = @transform_1, window_bounds = array<i64: 512, 128>}, {pipeline_mode = #tpu.pipeline_mode<synchronous>, transform_indices = @transform_2, window_bounds = array<i64: 1, 128>}, {pipeline_mode = #tpu.pipeline_mode<synchronous>, transform_indices = @transform_3, window_bounds = array<i64: 128, 128>}, {pipeline_mode = #tpu.pipeline_mode<synchronous>, transform_indices = @transform_4, window_bounds = array<i64: 1, 128>}, {transform_indices = @transform_5, window_bounds = array<i64: 8, 128>}]} {
    %c0 = arith.constant 0 : index
    %c0_0 = arith.constant 0 : index
    %0 = vector.load %arg1[%c0, %c0_0] : memref<8x512xf32, #tpu.memory_space<vmem>>, vector<8x512xf32>
    %c0_1 = arith.constant 0 : index
    %c0_2 = arith.constant 0 : index
    %1 = vector.load %arg2[%c0_1, %c0_2] : memref<512x128xf32, #tpu.memory_space<vmem>>, vector<512x128xf32>
    %cst = arith.constant dense<0.000000e+00> : vector<8x128xf32>
    %2 = tpu.matmul %0, %1, %cst {dimension_numbers = #tpu.dot_dimension_numbers<[1], [0], [0], [1], [0, 0, 1, 1], [], []>} : vector<8x512xf32>, vector<512x128xf32>, vector<8x128xf32> -> vector<8x128xf32>
    %c0_3 = arith.constant 0 : index
    %c0_4 = arith.constant 0 : index
    %3 = vector.load %arg3[%c0_3, %c0_4] : memref<1x128xf32, #tpu.memory_space<vmem>>, vector<1x128xf32>
    %4 = vector.broadcast %3 : vector<1x128xf32> to vector<8x128xf32>
    %5 = arith.addf %2, %4 : vector<8x128xf32>
    %cst_5 = arith.constant 0.000000e+00 : f32
    %6 = vector.broadcast %cst_5 : f32 to vector<8x128xf32>
    %7 = arith.maximumf %5, %6 : vector<8x128xf32>
    %c0_6 = arith.constant 0 : index
    %c0_7 = arith.constant 0 : index
    %8 = vector.load %arg4[%c0_6, %c0_7] : memref<128x128xf32, #tpu.memory_space<vmem>>, vector<128x128xf32>
    %cst_8 = arith.constant dense<0.000000e+00> : vector<8x128xf32>
    %9 = tpu.matmul %7, %8, %cst_8 {dimension_numbers = #tpu.dot_dimension_numbers<[1], [0], [0], [1], [0, 0, 1, 1], [], []>} : vector<8x128xf32>, vector<128x128xf32>, vector<8x128xf32> -> vector<8x128xf32>
    %c0_9 = arith.constant 0 : index
    %c0_10 = arith.constant 0 : index
    %10 = vector.load %arg5[%c0_9, %c0_10] : memref<1x128xf32, #tpu.memory_space<vmem>>, vector<1x128xf32>
    %11 = vector.broadcast %10 : vector<1x128xf32> to vector<8x128xf32>
    %12 = arith.addf %9, %11 : vector<8x128xf32>
    %c0_11 = arith.constant 0 : index
    %c0_12 = arith.constant 0 : index
    %13 = vector.load %arg6[%c0_11, %c0_12] : memref<8x128xf32, #tpu.memory_space<vmem>>, vector<8x128xf32>
    tpu.vector_store %arg6[%c0_11, %c0_12], %12 {strides = array<i32>} : memref<8x128xf32, #tpu.memory_space<vmem>>, vector<8x128xf32>,
    return
  }
  func.func @transform_0(%arg0: i32) -> (i32, i32) {
    %c0_i32 = arith.constant 0 : i32
    %c0_i32_0 = arith.constant 0 : i32
    return %arg0, %c0_i32 : i32, i32
  }
  func.func @transform_1(%arg0: i32) -> (i32, i32) {
    %c0_i32 = arith.constant 0 : i32
    %c0_i32_0 = arith.constant 0 : i32
    %c0_i32_1 = arith.constant 0 : i32
    return %c0_i32, %c0_i32_0 : i32, i32
  }
  func.func @transform_2(%arg0: i32) -> (i32, i32) {
    %c0_i32 = arith.constant 0 : i32
    %c0_i32_0 = arith.constant 0 : i32
    %c0_i32_1 = arith.constant 0 : i32
    return %c0_i32, %c0_i32_0 : i32, i32
  }
  func.func @transform_3(%arg0: i32) -> (i32, i32) {
    %c0_i32 = arith.constant 0 : i32
    %c0_i32_0 = arith.constant 0 : i32
    %c0_i32_1 = arith.constant 0 : i32
    return %c0_i32, %c0_i32_0 : i32, i32
  }
  func.func @transform_4(%arg0: i32) -> (i32, i32) {
    %c0_i32 = arith.constant 0 : i32
    %c0_i32_0 = arith.constant 0 : i32
    %c0_i32_1 = arith.constant 0 : i32
    return %c0_i32, %c0_i32_0 : i32, i32
  }
  func.func @transform_5(%arg0: i32) -> (i32, i32) {
    %c0_i32 = arith.constant 0 : i32
    %c0_i32_0 = arith.constant 0 : i32
    return %arg0, %c0_i32 : i32, i32
  }
}

</mosaic_0001>

<bundles_post_ra>
// kernel: blip2clip_mlp_forward.1
= control target key start
LH: loop header
LB: loop body
LE: loop exit
PB: predicated region body
PF: predicated region fallthrough
CT: control target
= control target key end

     0   :  { %s889_s0 = inlined_call_operand.vmem [shape: f32[8,512], index: 0, kind: input, shape index: {}]   ;;  %s890_s1 = inlined_call_operand.vmem [shape: f32[512,128], index: 1, kind: input, shape index: {}]   ;;  %s891_s2 = inlined_call_operand.vmem [shape: f32[1,128], index: 2, kind: input, shape index: {}]   ;;  %s892_s3 = inlined_call_operand.vmem [shape: f32[128,128], index: 3, kind: input, shape index: {}]   ;;  %s893_s4 = inlined_call_operand.vmem [shape: f32[1,128], index: 4, kind: input, shape index: {}]   ;;  %s894_s5 = inlined_call_operand.hbm [shape: f32[8,128], index: 5, kind: output, shape index: {}]  }
   0x1   :  { %v41_v0 = vld [vmem:[%s890_s1 + $0x80] sm:$0xff]  ;;  %v42_v1 = vld [vmem:[%s890_s1 + $0x88] sm:$0xff]  ;;  %v43_v11 = vld [vmem:[%s890_s1 + $0x90] sm:$0xff] }
   0x2   :  { %v25_v2 = vld [vmem:[%s890_s1] sm:$0xff]  ;;  %v469_v3 = vpack.c.bf16 %v42_v1, %v41_v0  ;;  %v26_v4 = vld [vmem:[%s890_s1 + $0x8] sm:$0xff]  ;;  %v44_v13 = vld [vmem:[%s890_s1 + $0x98] sm:$0xff] }
   0x3   :  { %v73_v5 = vld [vmem:[%s890_s1 + $0x180] sm:$0xff]  ;;  %v74_v6 = vld [vmem:[%s890_s1 + $0x188] sm:$0xff]  ;;  %v471_v7 = vpack.c.bf16 %v26_v4, %v25_v2  ;;  %v27_v14 = vld [vmem:[%s890_s1 + $0x10] sm:$0xff]  ;;  %v473_v16 = vpack.c.bf16 %v44_v13, %v43_v11 }
   0x4   :  { %v501_v8 = vpack.c.bf16 %v74_v6, %v73_v5  ;;  %v57_v9 = vld [vmem:[%s890_s1 + $0x100] sm:$0xff]  ;;  %v58_v10 = vld [vmem:[%s890_s1 + $0x108] sm:$0xff]  ;;  %470 = vmatprep.subr.bf16.mxu0 %v469_v3  ;;  %v28_v15 = vld [vmem:[%s890_s1 + $0x18] sm:$0xff] }
   0x5   :  { %v503_v12 = vpack.c.bf16 %v58_v10, %v57_v9  ;;  %472 = vmatpush3.bf16.msra.mxu0 %v471_v7  ;;  %v475_v17 = vpack.c.bf16 %v28_v15, %v27_v14  ;;  %v75_v18 = vld [vmem:[%s890_s1 + $0x190] sm:$0xff]  ;;  %v76_v19 = vld [vmem:[%s890_s1 + $0x198] sm:$0xff]  ;;  %v45_v23 = vld [vmem:[%s890_s1 + $0xa0] sm:$0xff] }
   0x6   :  { %502 = vmatprep.subr.bf16.mxu1 %v501_v8  ;;  %v59_v20 = vld [vmem:[%s890_s1 + $0x110] sm:$0xff]  ;;  %v505_v21 = vpack.c.bf16 %v76_v19, %v75_v18  ;;  %v60_v22 = vld [vmem:[%s890_s1 + $0x118] sm:$0xff]  ;;  %v46_v24 = vld [vmem:[%s890_s1 + $0xa8] sm:$0xff]  ;;  %474 = vmatprep.subr.bf16.mxu0 %v473_v16 }
   0x7   :  { %504 = vmatpush3.bf16.msra.mxu1 %v503_v12  ;;  %v507_v25 = vpack.c.bf16 %v60_v22, %v59_v20  ;;  %v477_v26 = vpack.c.bf16 %v46_v24, %v45_v23  ;;  %v29_v27 = vld [vmem:[%s890_s1 + $0x20] sm:$0xff]  ;;  %v30_v28 = vld [vmem:[%s890_s1 + $0x28] sm:$0xff]  ;;  %v47_v35 = vld [vmem:[%s890_s1 + $0xb0] sm:$0xff] }
   0x8   :  { %v77_v29 = vld [vmem:[%s890_s1 + $0x1a0] sm:$0xff]  ;;  %506 = vmatprep.subr.bf16.mxu1 %v505_v21  ;;  %v78_v30 = vld [vmem:[%s890_s1 + $0x1a8] sm:$0xff]  ;;  %v479_v33 = vpack.c.bf16 %v30_v28, %v29_v27  ;;  %v48_v36 = vld [vmem:[%s890_s1 + $0xb8] sm:$0xff] }
   0x9   :  { %v61_v31 = vld [vmem:[%s890_s1 + $0x120] sm:$0xff]  ;;  %v62_v32 = vld [vmem:[%s890_s1 + $0x128] sm:$0xff]  ;;  %476 = vmatpush3.bf16.msra.mxu0 %v475_v17  ;;  %v509_v34 = vpack.c.bf16 %v78_v30, %v77_v29  ;;  %v31_v37 = vld [vmem:[%s890_s1 + $0x30] sm:$0xff]  ;;  %v481_v39 = vpack.c.bf16 %v48_v36, %v47_v35 }
   0xa   :  { %478 = vmatprep.subr.bf16.mxu0 %v477_v26  ;;  %v511_v38 = vpack.c.bf16 %v62_v32, %v61_v31  ;;  %v32_v40 = vld [vmem:[%s890_s1 + $0x38] sm:$0xff]  ;;  %v79_v41 = vld [vmem:[%s890_s1 + $0x1b0] sm:$0xff]  ;;  %v49_v46 = vld [vmem:[%s890_s1 + $0xc0] sm:$0xff] }
   0xb   :  { %508 = vmatpush3.bf16.msra.mxu1 %v507_v25  ;;  %v80_v42 = vld [vmem:[%s890_s1 + $0x1b8] sm:$0xff]  ;;  %v63_v44 = vld [vmem:[%s890_s1 + $0x130] sm:$0xff]  ;;  %v50_v47 = vld [vmem:[%s890_s1 + $0xc8] sm:$0xff]  ;;  %v483_v48 = vpack.c.bf16 %v32_v40, %v31_v37 }
   0xc   :  { %510 = vmatprep.subr.bf16.mxu1 %v509_v34  ;;  %v513_v43 = vpack.c.bf16 %v80_v42, %v79_v41  ;;  %v64_v45 = vld [vmem:[%s890_s1 + $0x138] sm:$0xff]  ;;  %v81_v49 = vld [vmem:[%s890_s1 + $0x1c0] sm:$0xff]  ;;  %v82_v50 = vld [vmem:[%s890_s1 + $0x1c8] sm:$0xff]  ;;  %v485_v52 = vpack.c.bf16 %v50_v47, %v49_v46 }
   0xd   :  { %480 = vmatpush3.bf16.msra.mxu0 %v479_v33  ;;  %v515_v51 = vpack.c.bf16 %v64_v45, %v63_v44  ;;  %v33_v53 = vld [vmem:[%s890_s1 + $0x40] sm:$0xff]  ;;  %v34_v54 = vld [vmem:[%s890_s1 + $0x48] sm:$0xff]  ;;  %v517_v56 = vpack.c.bf16 %v82_v50, %v81_v49  ;;  %v51_v58 = vld [vmem:[%s890_s1 + $0xd0] sm:$0xff] }
   0xe   :  { %482 = vmatprep.subr.bf16.mxu0 %v481_v39  ;;  %v65_v55 = vld [vmem:[%s890_s1 + $0x140] sm:$0xff]  ;;  %v66_v57 = vld [vmem:[%s890_s1 + $0x148] sm:$0xff]  ;;  %v52_v59 = vld [vmem:[%s890_s1 + $0xd8] sm:$0xff]  ;;  %v487_v62 = vpack.c.bf16 %v34_v54, %v33_v53 }
   0xf   :  { %512 = vmatpush3.bf16.msra.mxu1 %v511_v38  ;;  %v83_v60 = vld [vmem:[%s890_s1 + $0x1d0] sm:$0xff]  ;;  %v84_v61 = vld [vmem:[%s890_s1 + $0x1d8] sm:$0xff]  ;;  %v519_v63 = vpack.c.bf16 %v66_v57, %v65_v55  ;;  %v489_v0 = vpack.c.bf16 %v52_v59, %v51_v58  ;;  %v53_v6 = vld [vmem:[%s890_s1 + $0xe0] sm:$0xff] }
  0x10   :  { %514 = vmatprep.subr.bf16.mxu1 %v513_v43  ;;  %v35_v1 = vld [vmem:[%s890_s1 + $0x50] sm:$0xff]  ;;  %v36_v2 = vld [vmem:[%s890_s1 + $0x58] sm:$0xff]  ;;  %v521_v4 = vpack.c.bf16 %v84_v61, %v83_v60  ;;  %v54_v7 = vld [vmem:[%s890_s1 + $0xe8] sm:$0xff] }
  0x11   :  { %484 = vmatpush3.bf16.msra.mxu0 %v483_v48  ;;  %v67_v3 = vld [vmem:[%s890_s1 + $0x150] sm:$0xff]  ;;  %v68_v5 = vld [vmem:[%s890_s1 + $0x158] sm:$0xff]  ;;  %v85_v8 = vld [vmem:[%s890_s1 + $0x1e0] sm:$0xff]  ;;  %v491_v10 = vpack.c.bf16 %v36_v2, %v35_v1  ;;  %v493_v14 = vpack.c.bf16 %v54_v7, %v53_v6 }
  0x12   :  { %486 = vmatprep.subr.bf16.mxu0 %v485_v52  ;;  %v86_v9 = vld [vmem:[%s890_s1 + $0x1e8] sm:$0xff]  ;;  %v37_v11 = vld [vmem:[%s890_s1 + $0x60] sm:$0xff]  ;;  %v523_v13 = vpack.c.bf16 %v68_v5, %v67_v3  ;;  %v55_v19 = vld [vmem:[%s890_s1 + $0xf0] sm:$0xff] }
  0x13   :  { %516 = vmatpush3.bf16.msra.mxu1 %v515_v51  ;;  %v38_v12 = vld [vmem:[%s890_s1 + $0x68] sm:$0xff]  ;;  %v69_v15 = vld [vmem:[%s890_s1 + $0x160] sm:$0xff]  ;;  %v525_v18 = vpack.c.bf16 %v86_v9, %v85_v8  ;;  %v56_v20 = vld [vmem:[%s890_s1 + $0xf8] sm:$0xff] }
  0x14   :  { %518 = vmatprep.subr.bf16.mxu1 %v517_v56  ;;  %v70_v16 = vld [vmem:[%s890_s1 + $0x168] sm:$0xff]  ;;  %v24_v21 = vld [vmem:[%s889_s0 + $0x18] sm:$0xff]  ;;  %v87_v22 = vld [vmem:[%s890_s1 + $0x1f0] sm:$0xff]  ;;  %v495_v24 = vpack.c.bf16 %v38_v12, %v37_v11  ;;  %v497_v26 = vpack.c.bf16 %v56_v20, %v55_v19 }
  0x15   :  { %488 = vmatpush3.bf16.msra.mxu0 %v487_v62  ;;  %v22_v17 = vld [vmem:[%s889_s0 + $0x8] sm:$0xff]  ;;  %v88_v23 = vld [vmem:[%s890_s1 + $0x1f8] sm:$0xff]  ;;  %230 = vmatprep.mubr.f32.mxu1 %v24_v21  ;;  %v527_v25 = vpack.c.bf16 %v70_v16, %v69_v15  ;;  %v39_v27 = vld [vmem:[%s890_s1 + $0x70] sm:$0xff] }
  0x16   :  { %490 = vmatprep.subr.bf16.mxu0 %v489_v0  ;;  %160 = vmatprep.mubr.f32.mxu0 %v22_v17  ;;  %v40_v28 = vld [vmem:[%s890_s1 + $0x78] sm:$0xff]  ;;  %v529_v29 = vpack.c.bf16 %v88_v23, %v87_v22  ;;  %v71_v30 = vld [vmem:[%s890_s1 + $0x170] sm:$0xff] }
  0x17   :  { %520 = vmatpush3.bf16.msra.mxu1 %v519_v63  ;;  %v72_v31 = vld [vmem:[%s890_s1 + $0x178] sm:$0xff] }
  0x18   :  { %522 = vmatprep.subr.bf16.mxu1 %v521_v4 }
  0x19   :  { %492 = vmatpush3.bf16.msra.mxu0 %v491_v10 }
  0x1a   :  { %494 = vmatprep.subr.bf16.mxu0 %v493_v14 }
  0x1b   :  { %524 = vmatpush3.bf16.msra.mxu1 %v523_v13 }
  0x1c   :  { %526 = vmatprep.subr.bf16.mxu1 %v525_v18 }
  0x1d   :  { %10 = vsyncpa [#allocation3], 0  ;;  %496 = vmatpush3.bf16.msra.mxu0 %v495_v24  ;;  %v499_v32 = vpack.c.bf16 %v40_v28, %v39_v27  ;;  %v531_v33 = vpack.c.bf16 %v72_v31, %v71_v30  ;;  %v237_v34 = vld [vmem:[%s892_s3] sm:$0xff]  ;;  %v238_v35 = vld [vmem:[%s892_s3 + $0x8] sm:$0xff]  ;;  %v585_v39 = vmov 0.0|0.0   ;;  %vm586_vm0 = vmmov 0  }
  0x1e   :  { %498 = vmatprep.subr.bf16.mxu0 %v497_v26  ;;  %v21_v36 = vld [vmem:[%s889_s0] sm:$0xff]  ;;  %v534_v37 = vpack.c.bf16 %v238_v35, %v237_v34  ;;  %v23_v38 = vld [vmem:[%s889_s0 + $0x10] sm:$0xff]  ;;  %v240_v41 = vld [vmem:[%s892_s3 + $0x18] sm:$0xff]  ;;  %v587_v61 = vmov 0.0   ;;  %s588_s11 = smov [#allocation2]  }
  0x1f   :  { %528 = vmatpush3.bf16.msra.mxu1 %v527_v25  ;;  %v239_v40 = vld [vmem:[%s892_s3 + $0x10] sm:$0xff]  ;;  %v241_v43 = vld [vmem:[%s892_s3 + $0x20] sm:$0xff]  ;;  %v242_v44 = vld [vmem:[%s892_s3 + $0x28] sm:$0xff]  ;;  %s337_s12 = sshll.u32 %s588_s11, 4  ;;  %s338_s12 = int_to_ptr.vmem [resolvable:$true] %s337_s12 }
  0x20   :  { %530 = vmatprep.subr.bf16.mxu1 %v529_v29  ;;  %v537_v42 = vpack.c.bf16 %v240_v41, %v239_v40  ;;  %v540_v45 = vpack.c.bf16 %v242_v44, %v241_v43  ;;  %v243_v46 = vld [vmem:[%s892_s3 + $0x30] sm:$0xff]  ;;  %v244_v47 = vld [vmem:[%s892_s3 + $0x38] sm:$0xff]  ;;  %v245_v49 = vld [vmem:[%s892_s3 + $0x40] sm:$0xff]  ;;  %p566_p1 = scmp.lt.s32.totalorder %s338_s12, %s338_s12 }
  0x21   :  { %500 = vmatpush3.bf16.msra.mxu0 %v499_v32  ;;  %v543_v48 = vpack.c.bf16 %v244_v47, %v243_v46  ;;  %v246_v50 = vld [vmem:[%s892_s3 + $0x48] sm:$0xff]  ;;  %v247_v52 = vld [vmem:[%s892_s3 + $0x50] sm:$0xff]  ;;  %v248_v53 = vld [vmem:[%s892_s3 + $0x58] sm:$0xff] }
  0x22   :  { %533 = vmatprep.subr.bf16.mxu0 %v585_v39  ;;  %v546_v51 = vpack.c.bf16 %v246_v50, %v245_v49  ;;  %v549_v54 = vpack.c.bf16 %v248_v53, %v247_v52  ;;  %v249_v55 = vld [vmem:[%s892_s3 + $0x60] sm:$0xff]  ;;  %v250_v56 = vld [vmem:[%s892_s3 + $0x68] sm:$0xff]  ;;  %v251_v58 = vld [vmem:[%s892_s3 + $0x70] sm:$0xff] }
  0x23   :  { %532 = vmatpush3.bf16.msra.mxu1 %v531_v33  ;;  %v552_v57 = vpack.c.bf16 %v250_v56, %v249_v55  ;;  %v252_v59 = vld [vmem:[%s892_s3 + $0x78] sm:$0xff]  ;;  %v345_v63 = vld [vmem:[%s891_s2] ss:$0 sm:$0xff]  ;;  %s561_s2 = scalar_lea.vmem %s338_s12, 128 }
  0x24   :  { %161 = vmatmul.mubr.f32.vlgmr.msra.gmra.mrb[0].mxu0 %v21_v36  ;;  %v555_v60 = vpack.c.bf16 %v252_v59, %v251_v58  ;;  %v346_v8 = vld [vmem:[%s893_s4] ss:$0 sm:$0xff]  ;;  %p562_p0 = scmp.ne.s32.totalorder %s338_s12, %s561_s2  ;;  %p567_p2 = scmp.lt.s32.totalorder %s561_s2, %s561_s2 }
  0x25   :  { %535 = vmatpush3.bf16.msra.mxu0 %v534_v37  ;;  %466 = vmatprep.mubr.msk.f32.mxu0 %vm586_vm0, %v587_v61 }
  0x26   :  { %231 = vmatmul.mubr.f32.vlgmr.msra.gmra.mrb[0].mxu1 %v23_v38  ;;  %536 = vmatprep.subr.bf16.mxu0 %v585_v39  ;;  %p568_p3 = por %p567_p2, %p566_p1 }
  0x28   :  { %p569_p4 = pnand %p568_p3, %p562_p0 }
  0x29   :  { %538 = vmatpush3.bf16.msra.mxu0 %v537_v42 }
  0x2a   :  { %539 = vmatprep.subr.bf16.mxu0 %v585_v39 }
  0x2d   :  { %541 = vmatpush3.bf16.msra.mxu0 %v540_v45 }
  0x2e   :  { %542 = vmatprep.subr.bf16.mxu0 %v585_v39 }
  0x31   :  { %544 = vmatpush3.bf16.msra.mxu0 %v543_v48 }
  0x32   :  { %545 = vmatprep.subr.bf16.mxu0 %v585_v39 }
  0x35   :  { %547 = vmatpush3.bf16.msra.mxu0 %v546_v51 }
  0x36   :  { %548 = vmatprep.subr.bf16.mxu0 %v585_v39 }
  0x39   :  { %550 = vmatpush3.bf16.msra.mxu0 %v549_v54 }
  0x3a   :  { %551 = vmatprep.subr.bf16.mxu0 %v585_v39 }
  0x3d   :  { %553 = vmatpush3.bf16.msra.mxu0 %v552_v57 }
  0x3e   :  { %554 = vmatprep.subr.bf16.mxu0 %v585_v39 }
  0x41   :  { %556 = vmatpush3.bf16.msra.mxu0 %v555_v60 }
  0xf7   :  { %v379_v62 = vpop.f32.mrb[0].mxu0 }
  0xf8   :  { %v380_v0 = vpop.f32.mrb[1].mxu0 }
  0xf9   :  { %v414_v1 = vpop.f32.mrb[0].mxu1  ;;  %v381_v2 = vadd.f32 %v380_v0, %v379_v62 }
  0xfa   :  { %v415_v3 = vpop.f32.mrb[1].mxu1 }
  0xfb   :  { %v416_v4 = vadd.f32 %v415_v3, %v414_v1  ;;  %v163_v5 = vadd.f32 %v381_v2, %v345_v63 }
  0xfd   :  { %v233_v6 = vadd.f32 %v416_v4, %v163_v5 }
  0xff   :  { %v236_v7 = vmax.f32 %v233_v6, 0.0 }
 0x101   :  { %467 = vmatmul.mubr.f32.vlgmr.msra.gmra.mrb[2].mxu0 %v236_v7 }
 0x1d4   :  { %v326_v9 = vpop.f32.mrb[2].mxu0 }
 0x1d5   :  { %v327_v10 = vadd.f32 %v346_v8, %v326_v9  ;;  %v468_v11 = vpop.f32.mrb[3].mxu0 }
 0x1d7   :  { %330 = vst [vmem:[#allocation2] sm:$0xff] %v327_v10 }
 0x1d8   :  { %572 = shalt.err (!%p569_p4)
}
 0x1d9   :  { %s573_s14 = scalar_lea.hbm %s894_s5, 128 }
 0x1da   :  { %p574_p5 = scmp.ne.s32.totalorder %s894_s5, %s573_s14  ;;  %p577_p6 = scmp.lt.u32.totalorder %s573_s14, %s894_s5 }
 0x1dc   :  { %p579_p7 = pnand %p577_p6, %p574_p5 }
 0x1de   :  { %582 = shalt.err (!%p579_p7)
}
 0x1df   :  { %340 = dma.vmem_to_hbm [thread:$0]  %s338_s12, 128, %s894_s5, [#allocation3]  }
 0x1e0   :  { %583 = dma.done.wait [#allocation3], 128  }
 0x1e1   :  { %584 = vsyncadd [#allocation3], 4294967168 }
 0x1e2   :  { %344 = vsyncpa [#allocation3], 1 }

</bundles_post_ra>
